<compile_context>
chip_gen: v7x
topology: tpu7x:2x2x1
jax: 0.10.0
libtpu: 0.0.40
codegen_flags: <defaults>
</compile_context>

<pallas_src>
import jax
import jax.numpy as jnp
from jax.experimental import pallas as pl
from jax.experimental.pallas import tpu as pltpu


def packed_set_mlp_kernel(x_ref, w1_ref, b1_ref, w2_ref, b2_ref, o_ref):
    """All agents in one pass via block-diagonal packed weights.

    x_ref : (1, A*IN)    w1_ref: (A*IN, A*H)   b1_ref: (1, A*H)
    w2_ref: (A*H, A*OUT) b2_ref: (1, A*OUT)    o_ref : (1, A*OUT)
    """
    x = x_ref[...]                                            # (1, A*IN)
    h = jnp.dot(x, w1_ref[...],
                preferred_element_type=jnp.float32) + b1_ref[...]
    h = jnp.maximum(h, 0.0)                                   # ReLU
    y = jnp.dot(h, w2_ref[...],
                preferred_element_type=jnp.float32) + b2_ref[...]
    o_ref[...] = y.astype(o_ref.dtype)                        # single lane-dense store


def _block_diag(stack):
    """(A, m, n) per-agent matrices -> (A*m, A*n) block-diagonal matrix."""
    A, m, n = stack.shape
    eye = jnp.eye(A, dtype=stack.dtype)                        # (A, A)
    return jnp.einsum("ab,amn->ambn", eye, stack).reshape(A * m, A * n)


def set_of_agents_forward(x, w1, b1, w2, b2):
    """x: [A, IN] f32; per-agent weights W1 [A,IN,H], b1 [A,1,H],
    W2 [A,H,OUT], b2 [A,1,OUT]. Returns [A, OUT] == torch.cat of per-agent outs."""
    A, IN = x.shape
    H = w1.shape[2]
    OUT = w2.shape[2]

    # One-time packing (outside the kernel; amortized across forward calls in
    # a real deployment since the weights are static between optimizer steps).
    w1_bd = _block_diag(w1)                     # (A*IN, A*H)   = (128, 128)
    w2_bd = _block_diag(w2)                     # (A*H,  A*OUT) = (128, 32)
    b1_flat = b1.reshape(1, A * H)              # (1, A*H)
    b2_flat = b2.reshape(1, A * OUT)            # (1, A*OUT)
    x_flat = x.reshape(1, A * IN)               # (1, A*IN)

    vmem = pl.BlockSpec(memory_space=pltpu.MemorySpace.VMEM)

    out = pl.pallas_call(
        packed_set_mlp_kernel,
        out_shape=jax.ShapeDtypeStruct((1, A * OUT), jnp.float32),
        in_specs=[vmem, vmem, vmem, vmem, vmem],   # full arrays, one DMA each
        out_specs=vmem,                            # one lane-dense output slab
    )(x_flat, w1_bd, b1_flat, w2_bd, b2_flat)

    # Un-pack: (1, A*OUT) -> (A, OUT), matching torch.cat over (1, OUT) outputs.
    return out.reshape(A, OUT)


def reference_forward(x, w1, b1, w2, b2):
    # Pure-JAX reference mirroring the PyTorch per-agent loop + torch.cat.
    outs = []
    for i in range(x.shape[0]):
        xi = x[i:i + 1]                              # (1, IN)
        h = jnp.maximum(xi @ w1[i] + b1[i], 0.0)     # (1, H)
        outs.append(h @ w2[i] + b2[i])               # (1, OUT)
    return jnp.concatenate(outs, axis=0)


# TODO(synk): optimizer_zero_grad / optimizer_step are training-time hooks on the
# abstract BaseAgentModel and have no forward-pass Pallas equivalent.

if __name__ == "__main__":
    NUM_AGENTS = 4
    IN_FEATURES = 32
    HIDDEN = 32
    OUT_FEATURES = 8

    key = jax.random.PRNGKey(0)
    kx, k1, k2, k3, k4 = jax.random.split(key, 5)

    x = jax.random.normal(kx, (NUM_AGENTS, IN_FEATURES), dtype=jnp.float32)

    # Per-agent (cloned-then-independent) weights, deterministic init.
    w1 = jax.random.normal(k1, (NUM_AGENTS, IN_FEATURES, HIDDEN),
                           dtype=jnp.float32) * 0.1
    b1 = jax.random.normal(k2, (NUM_AGENTS, 1, HIDDEN),
                           dtype=jnp.float32) * 0.1
    w2 = jax.random.normal(k3, (NUM_AGENTS, HIDDEN, OUT_FEATURES),
                           dtype=jnp.float32) * 0.1
    b2 = jax.random.normal(k4, (NUM_AGENTS, 1, OUT_FEATURES),
                           dtype=jnp.float32) * 0.1

    fwd = jax.jit(set_of_agents_forward)
    y = fwd(x, w1, b1, w2, b2)
    jax.block_until_ready(y)

    y_ref = reference_forward(x, w1, b1, w2, b2)
    assert y.shape == (NUM_AGENTS, OUT_FEATURES)
    assert jnp.allclose(y, y_ref, atol=1e-5, rtol=1e-5), "mismatch vs reference"

    print("KERNEL_OK")
</pallas_src>

<mosaic_0001>
module attributes {stable_mosaic.version = 11 : i64} {
  func.func @packed_set_mlp_kernel(%arg0: memref<1x128xf32, #tpu.memory_space<vmem>>, %arg1: memref<128x128xf32, #tpu.memory_space<vmem>>, %arg2: memref<1x128xf32, #tpu.memory_space<vmem>>, %arg3: memref<128x32xf32, #tpu.memory_space<vmem>>, %arg4: memref<1x32xf32, #tpu.memory_space<vmem>>, %arg5: memref<1x32xf32, #tpu.memory_space<vmem>>) attributes {dimension_semantics = [], scalar_prefetch = 0 : i64, scratch_operands = 0 : i64, tpu.core_type = #tpu.core_type<tc>} {
    %c0 = arith.constant 0 : index
    %c0_0 = arith.constant 0 : index
    %0 = vector.load %arg0[%c0, %c0_0] : memref<1x128xf32, #tpu.memory_space<vmem>>, vector<1x128xf32>
    %c0_1 = arith.constant 0 : index
    %c0_2 = arith.constant 0 : index
    %1 = vector.load %arg1[%c0_1, %c0_2] : memref<128x128xf32, #tpu.memory_space<vmem>>, vector<128x128xf32>
    %cst = arith.constant dense<0.000000e+00> : vector<1x128xf32>
    %2 = tpu.matmul %0, %1, %cst {dimension_numbers = #tpu.dot_dimension_numbers<[1], [0], [0], [1], [0, 0, 1, 1], [], []>} : vector<1x128xf32>, vector<128x128xf32>, vector<1x128xf32> -> vector<1x128xf32>
    %c0_3 = arith.constant 0 : index
    %c0_4 = arith.constant 0 : index
    %3 = vector.load %arg2[%c0_3, %c0_4] : memref<1x128xf32, #tpu.memory_space<vmem>>, vector<1x128xf32>
    %4 = arith.addf %2, %3 : vector<1x128xf32>
    %cst_5 = arith.constant 0.000000e+00 : f32
    %5 = vector.broadcast %cst_5 : f32 to vector<1x128xf32>
    %6 = arith.maximumf %4, %5 : vector<1x128xf32>
    %c0_6 = arith.constant 0 : index
    %c0_7 = arith.constant 0 : index
    %7 = vector.load %arg3[%c0_6, %c0_7] : memref<128x32xf32, #tpu.memory_space<vmem>>, vector<128x32xf32>
    %cst_8 = arith.constant dense<0.000000e+00> : vector<1x32xf32>
    %8 = tpu.matmul %6, %7, %cst_8 {dimension_numbers = #tpu.dot_dimension_numbers<[1], [0], [0], [1], [0, 0, 1, 1], [], []>} : vector<1x128xf32>, vector<128x32xf32>, vector<1x32xf32> -> vector<1x32xf32>
    %c0_9 = arith.constant 0 : index
    %c0_10 = arith.constant 0 : index
    %9 = vector.load %arg4[%c0_9, %c0_10] : memref<1x32xf32, #tpu.memory_space<vmem>>, vector<1x32xf32>
    %10 = arith.addf %8, %9 : vector<1x32xf32>
    %c0_11 = arith.constant 0 : index
    %c0_12 = arith.constant 0 : index
    %11 = vector.load %arg5[%c0_11, %c0_12] : memref<1x32xf32, #tpu.memory_space<vmem>>, vector<1x32xf32>
    tpu.vector_store %arg5[%c0_11, %c0_12], %10 {strides = array<i32>} : memref<1x32xf32, #tpu.memory_space<vmem>>, vector<1x32xf32>,
    return
  }
}

</mosaic_0001>

<bundles_post_ra>
// kernel: set_of_agents_forward.1
= control target key start
LH: loop header
LB: loop body
LE: loop exit
PB: predicated region body
PF: predicated region fallthrough
CT: control target
= control target key end

     0   :  { %v357_v0 = vmov 0.0|0.0   ;;  %vm358_vm0 = vmmov 0   ;;  %v359_v4 = vmov 0.0   ;;  %vm196_vm1 = vcmask 253952   ;;  %s514_s1 = inlined_call_operand.vmem [shape: f32[128,128], index: 1, kind: input, shape index: {}]   ;;  %s515_s3 = inlined_call_operand.vmem [shape: f32[128,32], index: 3, kind: input, shape index: {}]   ;;  %s516_s0 = inlined_call_operand.vmem [shape: f32[1,128], index: 0, kind: input, shape index: {}]   ;;  %s517_s2 = inlined_call_operand.vmem [shape: f32[1,128], index: 2, kind: input, shape index: {}]   ;;  %s518_s4 = inlined_call_operand.vmem [shape: f32[1,32], index: 4, kind: input, shape index: {}]   ;;  %s519_s5 = inlined_call_operand.vmem [shape: f32[1,32], index: 5, kind: output, shape index: {}]  }
   0x1   :  { %306 = vmatprep.subr.bf16.mxu0 %v357_v0  ;;  %v21_v1 = vld [vmem:[%s514_s1] sm:$0xff]  ;;  %v22_v2 = vld [vmem:[%s514_s1 + $0x8] sm:$0xff]  ;;  %v23_v3 = vld [vmem:[%s514_s1 + $0x10] sm:$0xff]  ;;  %268 = vmatprep.mubr.msk.f32.mxu0 %vm358_vm0, %v359_v4 }
   0x2   :  { %v307_v5 = vpack.c.bf16 %v22_v2, %v21_v1  ;;  %v24_v6 = vld [vmem:[%s514_s1 + $0x18] sm:$0xff]  ;;  %330 = vmatprep.subr.bf16.mxu1 %v357_v0  ;;  %303 = vmatprep.mubr.msk.f32.mxu1 %vm358_vm0, %v359_v4  ;;  %v25_v8 = vld [vmem:[%s514_s1 + $0x20] sm:$0xff]  ;;  %v26_v9 = vld [vmem:[%s514_s1 + $0x28] sm:$0xff] }
   0x3   :  { %v310_v7 = vpack.c.bf16 %v24_v6, %v23_v3  ;;  %v109_v10 = vld [vmem:[%s515_s3] sm:$0xff]  ;;  %v110_v11 = vld [vmem:[%s515_s3 + $0x8] sm:$0xff]  ;;  %v111_v12 = vld [vmem:[%s515_s3 + $0x10] sm:$0xff]  ;;  %v313_v14 = vpack.c.bf16 %v26_v9, %v25_v8 }
   0x4   :  { %308 = vmatpush3.bf16.msra.mxu0 %v307_v5  ;;  %v112_v13 = vld [vmem:[%s515_s3 + $0x18] sm:$0xff]  ;;  %v331_v15 = vpack.c.bf16 %v110_v11, %v109_v10  ;;  %v27_v16 = vld [vmem:[%s514_s1 + $0x30] sm:$0xff]  ;;  %v113_v19 = vld [vmem:[%s515_s3 + $0x20] sm:$0xff] }
   0x5   :  { %309 = vmatprep.subr.bf16.mxu0 %v357_v0  ;;  %v28_v17 = vld [vmem:[%s514_s1 + $0x38] sm:$0xff]  ;;  %v334_v18 = vpack.c.bf16 %v112_v13, %v111_v12  ;;  %v114_v20 = vld [vmem:[%s515_s3 + $0x28] sm:$0xff]  ;;  %v29_v22 = vld [vmem:[%s514_s1 + $0x40] sm:$0xff] }
   0x6   :  { %332 = vmatpush3.bf16.msra.mxu1 %v331_v15  ;;  %v316_v21 = vpack.c.bf16 %v28_v17, %v27_v16  ;;  %v30_v23 = vld [vmem:[%s514_s1 + $0x48] sm:$0xff]  ;;  %v337_v24 = vpack.c.bf16 %v114_v20, %v113_v19  ;;  %v115_v25 = vld [vmem:[%s515_s3 + $0x30] sm:$0xff]  ;;  %v116_v26 = vld [vmem:[%s515_s3 + $0x38] sm:$0xff] }
   0x7   :  { %333 = vmatprep.subr.bf16.mxu1 %v357_v0  ;;  %v319_v27 = vpack.c.bf16 %v30_v23, %v29_v22  ;;  %v31_v28 = vld [vmem:[%s514_s1 + $0x50] sm:$0xff]  ;;  %v32_v29 = vld [vmem:[%s514_s1 + $0x58] sm:$0xff]  ;;  %v340_v30 = vpack.c.bf16 %v116_v26, %v115_v25  ;;  %v117_v31 = vld [vmem:[%s515_s3 + $0x40] sm:$0xff] }
   0x8   :  { %311 = vmatpush3.bf16.msra.mxu0 %v310_v7  ;;  %v118_v32 = vld [vmem:[%s515_s3 + $0x48] sm:$0xff]  ;;  %v322_v33 = vpack.c.bf16 %v32_v29, %v31_v28  ;;  %v33_v34 = vld [vmem:[%s514_s1 + $0x60] sm:$0xff]  ;;  %v119_v37 = vld [vmem:[%s515_s3 + $0x50] sm:$0xff] }
   0x9   :  { %312 = vmatprep.subr.bf16.mxu0 %v357_v0  ;;  %v34_v35 = vld [vmem:[%s514_s1 + $0x68] sm:$0xff]  ;;  %v343_v36 = vpack.c.bf16 %v118_v32, %v117_v31  ;;  %v120_v38 = vld [vmem:[%s515_s3 + $0x58] sm:$0xff]  ;;  %v35_v40 = vld [vmem:[%s514_s1 + $0x70] sm:$0xff] }
   0xa   :  { %335 = vmatpush3.bf16.msra.mxu1 %v334_v18  ;;  %v325_v39 = vpack.c.bf16 %v34_v35, %v33_v34  ;;  %v36_v41 = vld [vmem:[%s514_s1 + $0x78] sm:$0xff]  ;;  %v346_v42 = vpack.c.bf16 %v120_v38, %v119_v37  ;;  %v121_v43 = vld [vmem:[%s515_s3 + $0x60] sm:$0xff]  ;;  %v122_v44 = vld [vmem:[%s515_s3 + $0x68] sm:$0xff] }
   0xb   :  { %336 = vmatprep.subr.bf16.mxu1 %v357_v0  ;;  %v328_v45 = vpack.c.bf16 %v36_v41, %v35_v40  ;;  %v349_v46 = vpack.c.bf16 %v122_v44, %v121_v43  ;;  %v20_v47 = vld [vmem:[%s516_s0] sm:$0x1]  ;;  %v123_v48 = vld [vmem:[%s515_s3 + $0x70] sm:$0xff]  ;;  %v124_v49 = vld [vmem:[%s515_s3 + $0x78] sm:$0xff] }
   0xc   :  { %314 = vmatpush3.bf16.msra.mxu0 %v313_v14  ;;  %v352_v50 = vpack.c.bf16 %v124_v49, %v123_v48  ;;  %v37_v51 = vld [vmem:[%s517_s2] sm:$0x1] }
   0xd   :  { %315 = vmatprep.subr.bf16.mxu0 %v357_v0  ;;  %v125_v56 = vld [vmem:[%s518_s4] sm:$0x1] }
   0xe   :  { %338 = vmatpush3.bf16.msra.mxu1 %v337_v24 }
   0xf   :  { %339 = vmatprep.subr.bf16.mxu1 %v357_v0 }
  0x10   :  { %317 = vmatpush3.bf16.msra.mxu0 %v316_v21 }
  0x11   :  { %318 = vmatprep.subr.bf16.mxu0 %v357_v0 }
  0x12   :  { %341 = vmatpush3.bf16.msra.mxu1 %v340_v30 }
  0x13   :  { %342 = vmatprep.subr.bf16.mxu1 %v357_v0 }
  0x14   :  { %320 = vmatpush3.bf16.msra.mxu0 %v319_v27 }
  0x15   :  { %321 = vmatprep.subr.bf16.mxu0 %v357_v0 }
  0x16   :  { %344 = vmatpush3.bf16.msra.mxu1 %v343_v36 }
  0x17   :  { %345 = vmatprep.subr.bf16.mxu1 %v357_v0 }
  0x18   :  { %323 = vmatpush3.bf16.msra.mxu0 %v322_v33 }
  0x19   :  { %324 = vmatprep.subr.bf16.mxu0 %v357_v0 }
  0x1a   :  { %347 = vmatpush3.bf16.msra.mxu1 %v346_v42 }
  0x1b   :  { %348 = vmatprep.subr.bf16.mxu1 %v357_v0 }
  0x1c   :  { %326 = vmatpush3.bf16.msra.mxu0 %v325_v39 }
  0x1d   :  { %327 = vmatprep.subr.bf16.mxu0 %v357_v0 }
  0x1e   :  { %350 = vmatpush3.bf16.msra.mxu1 %v349_v46 }
  0x1f   :  { %351 = vmatprep.subr.bf16.mxu1 %v357_v0 }
  0x20   :  { %329 = vmatpush3.bf16.msra.mxu0 %v328_v45 }
  0x22   :  { %353 = vmatpush3.bf16.msra.mxu1 %v352_v50 }
  0x23   :  { %269 = vmatmul.mubr.f32.vlgmr.msra.gmra.mrb[0].mxu0 %v20_v47 }
  0xf6   :  { %v104_v52 = vpop.f32.mrb[0].mxu0 }
  0xf7   :  { %v105_v53 = vadd.f32 %v104_v52, %v37_v51  ;;  %v270_v54 = vpop.f32.mrb[1].mxu0 }
  0xf9   :  { %v108_v55 = vmax.f32 %v105_v53, 0.0 }
  0xfb   :  { %304 = vmatmul.mubr.f32.vlgmr.msra.gmra.mrb[0].mxu1 %v108_v55 }
 0x1ce   :  { %v192_v57 = vpop.f32.mrb[0].mxu1 }
 0x1cf   :  { %v193_v58 = vadd.f32 %v192_v57, %v125_v56  ;;  %v305_v59 = vpop.f32.mrb[1].mxu1 }
 0x1d1   :  { %197 = vst.msk [vmem:[%s519_s5] sm:$0x1] %vm196_vm1, %v193_v58 }

</bundles_post_ra>
